<compile_context>
chip_gen: v7x
topology: tpu7x:2x2x1
jax: 0.10.0
libtpu: 0.0.40
codegen_flags: <defaults>
</compile_context>

<pallas_src>
import functools
import math

import jax
import jax.numpy as jnp
from jax.experimental import pallas as pl
from jax.experimental.pallas import tpu as pltpu

_E = math.e
_LANES = 128


def _round_up(x, m):
    return (x + m - 1) // m * m


def _sublane_multiple(dtype):
    itemsize = jnp.dtype(dtype).itemsize
    return {4: 8, 2: 16, 1: 32}.get(itemsize, 8)


def _device_kind():
    try:
        return jax.devices()[0].device_kind.lower()
    except Exception:
        return ""


def _slide_value_at_zero(scale):
    # f(0) under the PyTorch sequential-update semantics; used to correct for
    # zero-padded elements in the wrapper instead of masking them in-kernel.
    d1 = scale  # 0 >= 0 branch: scale*0/e + scale
    if d1 < 0:
        return d1 / math.log(_E - d1)
    return d1


def _slide_loss_kernel(pos_ref, neg_ref, acc_ref, *, scale, scale_over_e,
                       rows_valid, tile_rows, tiles_per_core,
                       needs_row_mask, approx_reciprocal):
    c = pl.program_id(0)
    i = pl.program_id(1)

    @pl.when(i == 0)
    def _():
        acc_ref[...] = jnp.zeros_like(acc_ref)

    d = pos_ref[...].astype(jnp.float32) - neg_ref[...].astype(jnp.float32)

    # First in-place update: positions with d >= 0 (scale/e precomputed).
    d1 = jnp.where(d >= 0, scale_over_e * d + scale, d)

    # Second in-place update: mask evaluated on the *updated* tensor, matching
    # the PyTorch sequential-assignment semantics for any `scale`.  Clamp the
    # log argument so the unselected branch never produces NaN.
    log_val = jnp.log(jnp.maximum(_E - d1, 1e-30))
    if approx_reciprocal:
        neg_branch = scale * pl.reciprocal(log_val, approx=True)
    else:
        neg_branch = scale / log_val
    d2 = jnp.where(d1 < 0, neg_branch, d1)

    def accumulate(vals):
        # (tile_rows,128) -> (tile_rows//8, 8, 128): reducing axis 0 is plain
        # elementwise vreg adds into the resident (8,128) accumulator block,
        # keeping the intra-vreg sublane reduce out of the hot loop.
        acc_ref[...] += jnp.sum(vals.reshape(tile_rows // 8, 8, _LANES), axis=0)

    if needs_row_mask:
        # Only blocks that overhang the slab (last/partial or phantom blocks)
        # pay for masking; everything else takes the unmasked fast path.
        block_row0 = (c * tiles_per_core + i) * tile_rows
        is_partial = block_row0 + tile_rows > rows_valid

        @pl.when(jnp.logical_not(is_partial))
        def _():
            accumulate(d2)

        @pl.when(is_partial)
        def _():
            row = block_row0 + jax.lax.broadcasted_iota(jnp.int32, d2.shape, 0)
            accumulate(jnp.where(row < rows_valid, d2, 0.0))
    else:
        accumulate(d2)


def _slide_loss_call(pos2d, neg2d, *, scale, rows_padded, num_cores,
                     core_parallel, max_tile_rows, approx_reciprocal):
    dtype = pos2d.dtype
    sub = _sublane_multiple(dtype)

    # Biggest tile that fits the budget; full coverage for small inputs.
    tile_rows = min(_round_up(max_tile_rows, sub),
                    _round_up(pl.cdiv(rows_padded, num_cores), sub))
    total_blocks = pl.cdiv(rows_padded, tile_rows)
    tiles_per_core = pl.cdiv(total_blocks, num_cores)
    coverage = num_cores * tiles_per_core * tile_rows
    needs_row_mask = coverage != rows_padded
    max_block = total_blocks - 1

    kernel = functools.partial(
        _slide_loss_kernel,
        scale=float(scale),
        scale_over_e=float(scale) / _E,
        rows_valid=rows_padded,
        tile_rows=tile_rows,
        tiles_per_core=tiles_per_core,
        needs_row_mask=needs_row_mask,
        approx_reciprocal=approx_reciprocal,
    )

    def in_map(c, i):
        # Clamp phantom trailing blocks into range; their contribution is
        # masked to zero in-kernel, so re-reading a valid block is harmless.
        return (jnp.minimum(c * tiles_per_core + i, max_block), 0)

    # VMEM budget: 2 inputs x 2 pipeline buffers x tile bytes + headroom,
    # generation-aware cap (v7x has only 64 MiB physical VMEM per TC).
    tile_bytes = tile_rows * _LANES * jnp.dtype(dtype).itemsize
    is_v7 = "v7" in _device_kind()
    cap = (48 << 20) if is_v7 else (100 << 20)
    vmem_limit_bytes = int(min(max(4 * tile_bytes + (8 << 20), 32 << 20), cap))

    if num_cores > 1 and core_parallel:
        dim_sems = (pltpu.CORE_PARALLEL, pltpu.ARBITRARY)
    else:
        dim_sems = (pltpu.ARBITRARY, pltpu.ARBITRARY)

    partials = pl.pallas_call(
        kernel,
        out_shape=jax.ShapeDtypeStruct((num_cores * 8, _LANES), jnp.float32),
        grid_spec=pltpu.PrefetchScalarGridSpec(
            num_scalar_prefetch=0,
            grid=(num_cores, tiles_per_core),
            in_specs=[
                pl.BlockSpec((tile_rows, _LANES), in_map),
                pl.BlockSpec((tile_rows, _LANES), in_map),
            ],
            out_specs=pl.BlockSpec((8, _LANES), lambda c, i: (c, 0)),
        ),
        compiler_params=pltpu.CompilerParams(
            dimension_semantics=dim_sems,
            vmem_limit_bytes=vmem_limit_bytes,
        ),
    )(pos2d, neg2d)

    # Final cross-sublane / cross-lane / cross-core reduce in the wrapper.
    return jnp.sum(partials)


def slide_loss(anc_pos, anc_neg, scale=1.0, max_tile_rows=8192,
               num_cores=None, approx_reciprocal=False):
    assert anc_pos.shape == anc_neg.shape
    n = int(anc_pos.size)
    assert n > 0

    if num_cores is None:
        # Only v7x has 2 TensorCores per chip; on single-TC v5e/v6e a second
        # grid axis is just a serial loop plus padding-granularity waste.
        num_cores = 2 if "v7" in _device_kind() else 1

    sub = _sublane_multiple(anc_pos.dtype)
    rows_padded = _round_up(pl.cdiv(n, _LANES), sub)
    pad_count = rows_padded * _LANES - n

    def to_slab(x):
        flat = x.reshape(-1)
        if pad_count:
            # Pad only to one (sublane, lane) tile -- at most sub*128-1 zeros;
            # their f(0) contribution is subtracted below instead of masking
            # every element in the hot loop.
            flat = jnp.pad(flat, (0, pad_count))
        return flat.reshape(rows_padded, _LANES)

    pos2d = to_slab(anc_pos)
    neg2d = to_slab(anc_neg)

    call = functools.partial(
        _slide_loss_call, pos2d, neg2d, scale=scale, rows_padded=rows_padded,
        max_tile_rows=max_tile_rows, approx_reciprocal=approx_reciprocal)

    try:
        total = call(num_cores=num_cores, core_parallel=True)
    except Exception:
        if num_cores == 1:
            raise
        # Fallback if core-parallel lowering is unavailable on this chip.
        total = call(num_cores=1, core_parallel=False)

    if pad_count:
        total = total - jnp.float32(pad_count * _slide_value_at_zero(float(scale)))
    return total * jnp.float32(1.0 / n)


def slide_loss_ref(anc_pos, anc_neg, scale=1.0):
    d = (anc_pos - anc_neg).astype(jnp.float32)
    d1 = jnp.where(d >= 0, scale * d / _E + scale, d)
    d2 = jnp.where(d1 < 0, scale / jnp.log(_E - d1), d1)
    return jnp.mean(d2)


# TODO(synk): SlideLoss.step() is a host-side scalar update of `scale`; it is
# not part of the forward pass and is intentionally not a kernel.


if __name__ == "__main__":
    key = jax.random.PRNGKey(0)
    k1, k2, k3, k4 = jax.random.split(key, 4)

    # NCHW-like shapes consistent with a typical use of this loss.
    shape = (2, 4, 16, 16)  # 2048 elements = 16 rows of 128 lanes
    anc_pos = jax.random.normal(k1, shape, dtype=jnp.float32)
    anc_neg = jax.random.normal(k2, shape, dtype=jnp.float32)

    out = slide_loss(anc_pos, anc_neg, scale=1.0)
    jax.block_until_ready(out)
    ref = slide_loss_ref(anc_pos, anc_neg, scale=1.0)
    assert jnp.allclose(out, ref, rtol=1e-5, atol=1e-6), (out, ref)

    # Ragged size (not a multiple of 128) to exercise the pad-correction path.
    shape2 = (3, 5, 7)  # 105 elements
    p2 = jax.random.normal(k3, shape2, dtype=jnp.float32)
    n2 = jax.random.normal(k4, shape2, dtype=jnp.float32)
    out2 = slide_loss(p2, n2, scale=1.5)
    jax.block_until_ready(out2)
    ref2 = slide_loss_ref(p2, n2, scale=1.5)
    assert jnp.allclose(out2, ref2, rtol=1e-5, atol=1e-6), (out2, ref2)

    print("KERNEL_OK")
</pallas_src>

<mosaic_0001>
module attributes {stable_mosaic.version = 11 : i64} {
  func.func @_slide_loss_kernel(%arg0: i32, %arg1: i32, %arg2: memref<16x128xf32, #tpu.memory_space<vmem>>, %arg3: memref<16x128xf32, #tpu.memory_space<vmem>>, %arg4: memref<8x128xf32, #tpu.memory_space<vmem>>) attributes {dimension_semantics = [#tpu.dimension_semantics<arbitrary>, #tpu.dimension_semantics<arbitrary>], iteration_bounds = array<i64: 1, 1>, scalar_prefetch = 0 : i64, scratch_operands = 0 : i64, tpu.core_type = #tpu.core_type<tc>, window_params = [{transform_indices = @transform_0, window_bounds = array<i64: 16, 128>}, {transform_indices = @transform_1, window_bounds = array<i64: 16, 128>}, {transform_indices = @transform_2, window_bounds = array<i64: 8, 128>}]} {
    %c0_i32 = arith.constant 0 : i32
    %0 = arith.cmpi eq, %arg1, %c0_i32 : i32
    %1 = arith.extui %0 : i1 to i32
    %c0_i32_0 = arith.constant 0 : i32
    %2 = arith.cmpi ne, %1, %c0_i32_0 : i32
    scf.if %2 {
      %cst_15 = arith.constant 0.000000e+00 : f32
      %28 = vector.broadcast %cst_15 : f32 to vector<8x128xf32>
      %c0_16 = arith.constant 0 : index
      %c0_17 = arith.constant 0 : index
      %29 = vector.load %arg4[%c0_16, %c0_17] : memref<8x128xf32, #tpu.memory_space<vmem>>, vector<8x128xf32>
      tpu.vector_store %arg4[%c0_16, %c0_17], %28 {strides = array<i32>} : memref<8x128xf32, #tpu.memory_space<vmem>>, vector<8x128xf32>,
    } else {
    }
    %c0 = arith.constant 0 : index
    %c0_1 = arith.constant 0 : index
    %3 = vector.load %arg2[%c0, %c0_1] : memref<16x128xf32, #tpu.memory_space<vmem>>, vector<16x128xf32>
    %c0_2 = arith.constant 0 : index
    %c0_3 = arith.constant 0 : index
    %4 = vector.load %arg3[%c0_2, %c0_3] : memref<16x128xf32, #tpu.memory_space<vmem>>, vector<16x128xf32>
    %5 = arith.subf %3, %4 : vector<16x128xf32>
    %cst = arith.constant 0.000000e+00 : f32
    %6 = vector.broadcast %cst : f32 to vector<16x128xf32>
    %7 = arith.cmpf oge, %5, %6 : vector<16x128xf32>
    %cst_4 = arith.constant 0.36787945 : f32
    %8 = vector.broadcast %cst_4 : f32 to vector<16x128xf32>
    %9 = arith.mulf %8, %5 : vector<16x128xf32>
    %cst_5 = arith.constant 1.000000e+00 : f32
    %10 = vector.broadcast %cst_5 : f32 to vector<16x128xf32>
    %11 = arith.addf %9, %10 : vector<16x128xf32>
    %12 = arith.select %7, %11, %5 : vector<16x128xi1>, vector<16x128xf32>
    %cst_6 = arith.constant 2.71828175 : f32
    %13 = vector.broadcast %cst_6 : f32 to vector<16x128xf32>
    %14 = arith.subf %13, %12 : vector<16x128xf32>
    %cst_7 = arith.constant 1.000000e-30 : f32
    %15 = vector.broadcast %cst_7 : f32 to vector<16x128xf32>
    %16 = arith.maximumf %14, %15 : vector<16x128xf32>
    %17 = math.log %16 : vector<16x128xf32>
    %cst_8 = arith.constant 1.000000e+00 : f32
    %18 = vector.broadcast %cst_8 : f32 to vector<16x128xf32>
    %19 = arith.divf %18, %17 : vector<16x128xf32>
    %cst_9 = arith.constant 0.000000e+00 : f32
    %20 = vector.broadcast %cst_9 : f32 to vector<16x128xf32>
    %21 = arith.cmpf olt, %12, %20 : vector<16x128xf32>
    %22 = arith.select %21, %19, %12 : vector<16x128xi1>, vector<16x128xf32>
    %c0_10 = arith.constant 0 : index
    %c0_11 = arith.constant 0 : index
    %23 = vector.load %arg4[%c0_10, %c0_11] : memref<8x128xf32, #tpu.memory_space<vmem>>, vector<8x128xf32>
    %24 = vector.shape_cast %22 : vector<16x128xf32> to vector<2x8x128xf32>
    %cst_12 = arith.constant dense<0.000000e+00> : vector<8x128xf32>
    %25 = vector.multi_reduction <add>, %24, %cst_12 [0] : vector<2x8x128xf32> to vector<8x128xf32>
    %26 = arith.addf %23, %25 : vector<8x128xf32>
    %c0_13 = arith.constant 0 : index
    %c0_14 = arith.constant 0 : index
    %27 = vector.load %arg4[%c0_13, %c0_14] : memref<8x128xf32, #tpu.memory_space<vmem>>, vector<8x128xf32>
    tpu.vector_store %arg4[%c0_13, %c0_14], %26 {strides = array<i32>} : memref<8x128xf32, #tpu.memory_space<vmem>>, vector<8x128xf32>,
    return
  }
  func.func @transform_0(%arg0: i32, %arg1: i32) -> (i32, i32) {
    %c1_i32 = arith.constant 1 : i32
    %0 = arith.muli %arg0, %c1_i32 : i32
    %1 = arith.addi %0, %arg1 : i32
    %c0_i32 = arith.constant 0 : i32
    %2 = arith.minsi %1, %c0_i32 : i32
    %c0_i32_0 = arith.constant 0 : i32
    %c0_i32_1 = arith.constant 0 : i32
    return %2, %c0_i32_0 : i32, i32
  }
  func.func @transform_1(%arg0: i32, %arg1: i32) -> (i32, i32) {
    %c1_i32 = arith.constant 1 : i32
    %0 = arith.muli %arg0, %c1_i32 : i32
    %1 = arith.addi %0, %arg1 : i32
    %c0_i32 = arith.constant 0 : i32
    %2 = arith.minsi %1, %c0_i32 : i32
    %c0_i32_0 = arith.constant 0 : i32
    %c0_i32_1 = arith.constant 0 : i32
    return %2, %c0_i32_0 : i32, i32
  }
  func.func @transform_2(%arg0: i32, %arg1: i32) -> (i32, i32) {
    %c0_i32 = arith.constant 0 : i32
    %c0_i32_0 = arith.constant 0 : i32
    return %arg0, %c0_i32 : i32, i32
  }
}

</mosaic_0001>

<bundles_post_ra>
// kernel: tpu_custom_call.1
= control target key start
LH: loop header
LB: loop body
LE: loop exit
PB: predicated region body
PF: predicated region fallthrough
CT: control target
= control target key end

     0   :  { %7 = vsyncpa [#allocation3], 0  ;;  %s261_s0 = inlined_call_operand.hbm [shape: f32[16,128], index: 0, kind: input, shape index: {}]   ;;  %s262_s1 = inlined_call_operand.hbm [shape: f32[16,128], index: 1, kind: input, shape index: {}]   ;;  %s263_s2 = inlined_call_operand.hbm [shape: f32[8,128], index: 2, kind: output, shape index: {}]  }
   0x1   :  { %8 = vsyncpa [#allocation6], 0 }
   0x2   :  { %9 = vsyncpa [#allocation4], 0  ;;  %s205_s9 = smov [#allocation2]   ;;  %s133_s13 = scalar_lea.hbm %s261_s0, 256 }
   0x3   :  { %s21_s10 = sshll.u32 %s205_s9, 4  ;;  %p134_p0 = scmp.ne.s32.totalorder %s261_s0, %s133_s13  ;;  %s22_s10 = int_to_ptr.vmem [resolvable:$true] %s21_s10 }
   0x4   :  { %p137_p1 = scmp.lt.u32.totalorder %s133_s13, %s261_s0 }
   0x6   :  { %p139_p2 = pnand %p137_p1, %p134_p0 }
   0x8   :  { %142 = shalt.err (!%p139_p2)
}
   0x9   :  { %s143_s18 = scalar_lea.vmem %s22_s10, 256  ;;  %p148_p4 = scmp.lt.s32.totalorder %s22_s10, %s22_s10 }
   0xa   :  { %p144_p3 = scmp.ne.s32.totalorder %s22_s10, %s143_s18  ;;  %p149_p5 = scmp.lt.s32.totalorder %s143_s18, %s143_s18 }
   0xc   :  { %p150_p6 = por %p149_p5, %p148_p4 }
   0xe   :  { %p151_p7 = pnand %p150_p6, %p144_p3 }
  0x10   :  { %154 = shalt.err (!%p151_p7)
}
  0x11   :  { %s206_s19 = smov 128   ;;  %s207_s20 = smov 8  }
  0x12   :  { %27 = dma.hbm_to_vmem [thread:$0]  %s261_s0, 256, %s22_s10, [#allocation3], %s206_s19, %s206_s19, %s207_s20  }
  0x13   :  { %s208_s23 = smov [#allocation5]   ;;  %s155_s27 = scalar_lea.hbm %s262_s1, 256 }
  0x14   :  { %s39_s24 = sshll.u32 %s208_s23, 4  ;;  %p156_p8 = scmp.ne.s32.totalorder %s262_s1, %s155_s27  ;;  %s40_s24 = int_to_ptr.vmem [resolvable:$true] %s39_s24 }
  0x15   :  { %p159_p9 = scmp.lt.u32.totalorder %s155_s27, %s262_s1 }
  0x17   :  { %p161_p10 = pnand %p159_p9, %p156_p8 }
  0x19   :  { %164 = shalt.err (!%p161_p10)
}
  0x1a   :  { %s165_s4 = scalar_lea.vmem %s40_s24, 256  ;;  %p170_p12 = scmp.lt.s32.totalorder %s40_s24, %s40_s24 }
  0x1b   :  { %p166_p11 = scmp.ne.s32.totalorder %s40_s24, %s165_s4  ;;  %p171_p13 = scmp.lt.s32.totalorder %s165_s4, %s165_s4 }
  0x1d   :  { %p172_p0 = por %p171_p13, %p170_p12 }
  0x1f   :  { %p173_p1 = pnand %p172_p0, %p166_p11 }
  0x21   :  { %176 = shalt.err (!%p173_p1)
}
  0x22   :  { %45 = dma.hbm_to_vmem [thread:$0]  %s262_s1, 256, %s40_s24, [#allocation6], %s206_s19, %s206_s19, %s207_s20  }
  0x23   :  { %199 = dma.done.wait [#allocation3], 256  }
  0x24   :  { %200 = vsyncadd [#allocation3], 4294967040 }
  0x25   :  { %201 = dma.done.wait [#allocation6], 256  }
  0x26   :  { %202 = vsyncadd [#allocation6], 4294967040  ;;  %v65_v0 = vld [vmem:[#allocation2] sm:$0xff]  ;;  %v66_v1 = vld [vmem:[#allocation2 + $0x8] sm:$0xff]  ;;  %s209_s1 = smov [#allocation7]  }
  0x27   :  { %v67_v2 = vld [vmem:[#allocation5] sm:$0xff]  ;;  %v68_v3 = vld [vmem:[#allocation5 + $0x8] sm:$0xff]  ;;  %s105_s6 = sshll.u32 %s209_s1, 4  ;;  %s106_s6 = int_to_ptr.vmem [resolvable:$true] %s105_s6 }
  0x28   :  { %v69_v4 = vsub.f32 %v65_v0, %v67_v2  ;;  %v70_v5 = vsub.f32 %v66_v1, %v68_v3  ;;  %s177_s7 = scalar_lea.vmem %s106_s6, 128  ;;  %p182_p3 = scmp.lt.s32.totalorder %s106_s6, %s106_s6 }
  0x29   :  { %p178_p2 = scmp.ne.s32.totalorder %s106_s6, %s177_s7  ;;  %p183_p4 = scmp.lt.s32.totalorder %s177_s7, %s177_s7 }
  0x2a   :  { %v73_v6 = vmul.f32 0.36787945, %v69_v4  ;;  %vm71_vm0 = vcmp.ge.f32.partialorder %v69_v4, 0.0  ;;  %v74_v7 = vmul.f32 0.36787945, %v70_v5  ;;  %vm72_vm1 = vcmp.ge.f32.partialorder %v70_v5, 0.0 }
  0x2b   :  { %p184_p5 = por %p183_p4, %p182_p3 }
  0x2c   :  { %v75_v8 = vadd.f32 1.0, %v73_v6  ;;  %v76_v9 = vadd.f32 1.0, %v74_v7 }
  0x2d   :  { %p185_p6 = pnand %p184_p5, %p178_p2 }
  0x2e   :  { %v77_v10 = vsel %vm71_vm0, %v75_v8, %v69_v4  ;;  %v78_v11 = vsel %vm72_vm1, %v76_v9, %v70_v5 }
  0x2f   :  { %v79_v12 = vsub.f32 2.7182817, %v77_v10  ;;  %v80_v13 = vsub.f32 2.7182817, %v78_v11  ;;  %vm91_vm2 = vcmp.lt.f32.partialorder %v77_v10, 0.0  ;;  %vm92_vm3 = vcmp.lt.f32.partialorder %v78_v11, 0.0 }
  0x31   :  { %v81_v14 = vmax.f32 %v79_v12, 1e-30  ;;  %v82_v15 = vmax.f32 %v80_v13, 1e-30 }
  0x33   :  { %125 = vlog2.f32 %v81_v14 }
  0x34   :  { %127 = vlog2.f32 %v82_v15 }
  0x3d   :  { %v126_v16 = vpop.eup %125 }
  0x3e   :  { %v128_v17 = vpop.eup %127  ;;  %v84_v18 = vmul.f32 0.6931472, %v126_v16 }
  0x3f   :  { %v86_v19 = vmul.f32 0.6931472, %v128_v17 }
  0x40   :  { %129 = vrcp.f32 %v84_v18 }
  0x41   :  { %131 = vrcp.f32 %v86_v19 }
  0x4a   :  { %v130_v20 = vpop.eup %129 }
  0x4b   :  { %v132_v21 = vpop.eup %131  ;;  %v93_v22 = vsel %vm91_vm2, %v130_v20, %v77_v10 }
  0x4c   :  { %v94_v23 = vsel %vm92_vm3, %v132_v21, %v78_v11 }
  0x4d   :  { %v96_v24 = vadd.f32 %v94_v23, %v93_v22 }
  0x4f   :  { %98 = vst [vmem:[#allocation7] sm:$0xff] %v96_v24 }
  0x50   :  { %188 = shalt.err (!%p185_p6)
}
  0x51   :  { %s189_s10 = scalar_lea.hbm %s263_s2, 128 }
  0x52   :  { %p190_p7 = scmp.ne.s32.totalorder %s263_s2, %s189_s10  ;;  %p193_p8 = scmp.lt.u32.totalorder %s189_s10, %s263_s2 }
  0x54   :  { %p195_p9 = pnand %p193_p8, %p190_p7 }
  0x56   :  { %198 = shalt.err (!%p195_p9)
}
  0x57   :  { %108 = dma.vmem_to_hbm [thread:$0]  %s106_s6, 128, %s263_s2, [#allocation4]  }
  0x58   :  { %203 = dma.done.wait [#allocation4], 128  }
  0x59   :  { %204 = vsyncadd [#allocation4], 4294967168 }
  0x5a   :  { %112 = vsyncpa [#allocation3], 1 }
  0x5b   :  { %113 = vsyncpa [#allocation6], 1 }
  0x5c   :  { %114 = vsyncpa [#allocation4], 1 }

</bundles_post_ra>
